<compile_context>
chip_gen: v7x
topology: tpu7x:2x2x1
jax: 0.10.0
libtpu: 0.0.40
codegen_flags: <defaults>
</compile_context>

<pallas_src>
import functools

import jax
import jax.numpy as jnp
import numpy as np
from jax import lax
from jax.experimental import pallas as pl
from jax.experimental.pallas import tpu as pltpu

EPS = 1e-08


def _round_up(v, m):
    return ((v + m - 1) // m) * m


def _ccc_moments_kernel(x_ref, y_ref, bins_ref, out_ref, *,
                        n_rows, steps_per_core, chunk):
    """Accumulate per-core raw moments of (xv, y) into the resident out block.

    out block layout (8, chunk):
      row 0: sum(xv)    row 1: sum(y)     row 2: sum(xv*xv)
      row 3: sum(y*y)   row 4: sum(xv*y)  rows 5-7: unused (zero)
    """
    core = pl.program_id(0)
    step = pl.program_id(1)
    tile, d = x_ref.shape
    n_chunks = tile // chunk

    @pl.when(step == 0)
    def _init():
        out_ref[...] = jnp.zeros_like(out_ref)

    # First row of this block (unclamped): clamped/OOB steps on the padded
    # parallel axis get row0 >= n_rows and are fully masked below.
    row0 = (core * steps_per_core + step) * tile
    rows_left = n_rows - row0                      # scalar, may be <= 0

    lane = lax.broadcasted_iota(jnp.int32, (1, chunk), 1)
    bins_b = jnp.broadcast_to(bins_ref[...].astype(jnp.float32), (d, chunk))

    zero = jnp.zeros((1, chunk), jnp.float32)
    px, py, pxx, pyy, pxy = zero, zero, zero, zero, zero

    for k in range(n_chunks):
        r0 = k * chunk
        # (chunk, D) natural-layout logits -> (D, chunk) lane-dense.
        xc = x_ref[r0:r0 + chunk, :].astype(jnp.float32)
        xt = jnp.transpose(xc, (1, 0))
        yc = y_ref[:, r0:r0 + chunk].astype(jnp.float32)      # (1, chunk)

        valid = lane < (rows_left - r0)                       # (1, chunk) bool
        # Neutralize uninitialized tail columns *before* exp (Inf/NaN safety).
        xt = jnp.where(valid, xt, 0.0)

        m = jnp.max(xt, axis=0, keepdims=True)                # (1, chunk)
        e = jnp.exp(xt - m)                                   # (D, chunk) EUP
        s = jnp.sum(e, axis=0, keepdims=True)                 # softmax denom
        t = jnp.sum(e * bins_b, axis=0, keepdims=True)        # sum(e * bins)
        # Softmax expectation; padded columns forced to exactly 0.
        xv = jnp.where(valid, t / s, 0.0)
        yv = jnp.where(valid, yc, 0.0)

        px = px + xv
        py = py + yv
        pxx = pxx + xv * xv
        pyy = pyy + yv * yv
        pxy = pxy + xv * yv

    out_ref[0:1, :] += px
    out_ref[1:2, :] += py
    out_ref[2:3, :] += pxx
    out_ref[3:4, :] += pyy
    out_ref[4:5, :] += pxy


def ccc_loss(x, y, bins, *, tile_rows=8192, chunk=128, num_cores=2):
    """CCC loss (weight=None path). x: (N, D) logits, y: (N,), bins: (D,).

    tile_rows: rows streamed per grid step (rounded to a multiple of `chunk`);
      8192 rows ~ 640 KiB/block keeps the pipeline on the HBM roofline while
      staying far under VMEM limits on v5e/v6e/v7x.
    chunk: rows per unrolled inner piece (bounds the live vreg set) and the
      lane width of the vector accumulators.
    num_cores: parallel grid slots; 2 exploits both TensorCores on v7x and is
      harmless (serialized) on single-core chips.
    """
    N, D = x.shape
    assert D > 1, "digitize_num == 1 path not implemented"  # TODO(synk)

    tile = int(min(tile_rows, _round_up(N, chunk)))
    tile = _round_up(max(tile, chunk), chunk)
    total_blocks = int(pl.cdiv(N, tile))
    steps = int(pl.cdiv(total_blocks, num_cores))
    last_blk = total_blocks - 1

    y2 = y.reshape(1, N)                          # free view, no HBM traffic
    bins2 = bins.reshape(D, 1).astype(jnp.float32)

    def x_map(c, i):
        return (jnp.minimum(c * steps + i, last_blk), 0)

    def y_map(c, i):
        return (0, jnp.minimum(c * steps + i, last_blk))

    kernel = functools.partial(_ccc_moments_kernel, n_rows=N,
                               steps_per_core=steps, chunk=chunk)

    moments = pl.pallas_call(
        kernel,
        out_shape=jax.ShapeDtypeStruct((num_cores * 8, chunk), jnp.float32),
        grid_spec=pltpu.PrefetchScalarGridSpec(
            num_scalar_prefetch=0,
            grid=(num_cores, steps),
            in_specs=[
                pl.BlockSpec((tile, D), x_map),
                pl.BlockSpec((1, tile), y_map),
                pl.BlockSpec((D, 1), lambda c, i: (0, 0)),
            ],
            out_specs=pl.BlockSpec((8, chunk), lambda c, i: (c, 0)),
        ),
        compiler_params=pltpu.CompilerParams(
            dimension_semantics=("parallel", "arbitrary")),
    )(x, y2, bins2)

    # Trivial combine + CCC finalize in JAX (scalar work).
    parts = moments.reshape(num_cores, 8, chunk)[:, :5, :]
    sum_x, sum_y, sum_xx, sum_yy, sum_xy = jnp.sum(parts, axis=(0, 2))

    n = jnp.float32(N)
    x_m = sum_x / n
    y_m = sum_y / n
    vxx = jnp.maximum(sum_xx - n * x_m * x_m, 0.0)
    vyy = jnp.maximum(sum_yy - n * y_m * y_m, 0.0)
    vxy = sum_xy - n * x_m * y_m

    rho = vxy / (jnp.sqrt(vxx) * jnp.sqrt(vyy) + EPS)
    x_s = jnp.sqrt(vxx / (n - 1.0))               # torch.std is unbiased (N-1)
    y_s = jnp.sqrt(vyy / (n - 1.0))
    ccc = (2.0 * rho * x_s * y_s
           / (x_s * x_s + y_s * y_s + (x_m - y_m) ** 2 + EPS))
    return 1.0 - ccc


def ccc_loss_ref(x, y, bins):
    """Pure-JAX reference mirroring the PyTorch forward (weight=None)."""
    x = x.astype(jnp.float32)
    y = y.reshape(-1).astype(jnp.float32)
    p = jax.nn.softmax(x, axis=-1)
    xv = jnp.sum(p * bins.reshape(1, -1), axis=-1)
    x_m, y_m = jnp.mean(xv), jnp.mean(y)
    vx, vy = xv - x_m, y - y_m
    rho = jnp.sum(vx * vy) / (jnp.sqrt(jnp.sum(vx ** 2)) * jnp.sqrt(jnp.sum(vy ** 2)) + EPS)
    x_s = jnp.std(xv, ddof=1)
    y_s = jnp.std(y, ddof=1)
    ccc = 2 * rho * x_s * y_s / (x_s ** 2 + y_s ** 2 + (x_m - y_m) ** 2 + EPS)
    return 1 - ccc


if __name__ == "__main__":
    # Module params (deterministic, from __init__): digitize_num=20, range=[-1,1]
    digitize_num = 20
    bins = jnp.asarray(np.linspace(-1.0, 1.0, num=digitize_num), dtype=jnp.float32)

    N = 300
    key = jax.random.PRNGKey(0)
    kx, ky = jax.random.split(key)
    x = jax.random.normal(kx, (N, digitize_num), dtype=jnp.float32)   # logits
    y = jax.random.uniform(ky, (N,), minval=-1.0, maxval=1.0, dtype=jnp.float32)

    ref = jax.block_until_ready(ccc_loss_ref(x, y, bins))

    # Default path: one 384-row block, second parallel slot fully masked.
    out_default = jax.block_until_ready(ccc_loss(x, y, bins))
    assert jnp.allclose(out_default, ref, rtol=2e-4, atol=1e-4), (out_default, ref)

    # Small-tile path: multi-step streaming grid + clamped out-of-range step +
    # masked partial final block.
    out_small = jax.block_until_ready(ccc_loss(x, y, bins, tile_rows=128))
    assert jnp.allclose(out_small, ref, rtol=2e-4, atol=1e-4), (out_small, ref)

    print("KERNEL_OK")
</pallas_src>

<mosaic_0001>
module attributes {stable_mosaic.version = 11 : i64} {
  func.func @_ccc_moments_kernel(%arg0: i32, %arg1: i32, %arg2: memref<384x20xf32, #tpu.memory_space<vmem>>, %arg3: memref<1x384xf32, #tpu.memory_space<vmem>>, %arg4: memref<20x1xf32, #tpu.memory_space<vmem>>, %arg5: memref<8x128xf32, #tpu.memory_space<vmem>>) attributes {dimension_semantics = [#tpu.dimension_semantics<parallel>, #tpu.dimension_semantics<arbitrary>], iteration_bounds = array<i64: 2, 1>, scalar_prefetch = 0 : i64, scratch_operands = 0 : i64, tpu.core_type = #tpu.core_type<tc>, window_params = [{transform_indices = @transform_0, window_bounds = array<i64: 384, 20>}, {transform_indices = @transform_1, window_bounds = array<i64: 1, 384>}, {pipeline_mode = #tpu.pipeline_mode<synchronous>, transform_indices = @transform_2, window_bounds = array<i64: 20, 1>}, {transform_indices = @transform_3, window_bounds = array<i64: 8, 128>}]} {
    %c0_i32 = arith.constant 0 : i32
    %0 = arith.cmpi eq, %arg1, %c0_i32 : i32
    %1 = arith.extui %0 : i1 to i32
    %c0_i32_0 = arith.constant 0 : i32
    %2 = arith.cmpi ne, %1, %c0_i32_0 : i32
    scf.if %2 {
      %cst_47 = arith.constant 0.000000e+00 : f32
      %126 = vector.broadcast %cst_47 : f32 to vector<8x128xf32>
      %c0_48 = arith.constant 0 : index
      %c0_49 = arith.constant 0 : index
      %127 = vector.load %arg5[%c0_48, %c0_49] : memref<8x128xf32, #tpu.memory_space<vmem>>, vector<8x128xf32>
      tpu.vector_store %arg5[%c0_48, %c0_49], %126 {strides = array<i32>} : memref<8x128xf32, #tpu.memory_space<vmem>>, vector<8x128xf32>,
    } else {
    }
    %c1_i32 = arith.constant 1 : i32
    %3 = arith.muli %arg0, %c1_i32 : i32
    %4 = arith.addi %3, %arg1 : i32
    %c384_i32 = arith.constant 384 : i32
    %5 = arith.muli %4, %c384_i32 : i32
    %c300_i32 = arith.constant 300 : i32
    %6 = arith.subi %c300_i32, %5 : i32
    %7 = tpu.iota {dimensions = array<i32: 1>} : vector<1x128xi32>
    %c0 = arith.constant 0 : index
    %c0_1 = arith.constant 0 : index
    %8 = vector.load %arg4[%c0, %c0_1] : memref<20x1xf32, #tpu.memory_space<vmem>>, vector<20x1xf32>
    %9 = vector.shape_cast %8 : vector<20x1xf32> to vector<20x1xf32>
    %10 = vector.broadcast %9 : vector<20x1xf32> to vector<20x128xf32>
    %cst = arith.constant 0.000000e+00 : f32
    %11 = vector.broadcast %cst : f32 to vector<1x128xf32>
    %c0_2 = arith.constant 0 : index
    %c0_3 = arith.constant 0 : index
    %12 = vector.load %arg2[%c0_2, %c0_3] : memref<384x20xf32, #tpu.memory_space<vmem>>, vector<128x20xf32>
    %13 = tpu.transpose %12, [1, 0] : vector<128x20xf32> -> vector<20x128xf32>
    %c0_4 = arith.constant 0 : index
    %c0_5 = arith.constant 0 : index
    %14 = vector.load %arg3[%c0_4, %c0_5] : memref<1x384xf32, #tpu.memory_space<vmem>>, vector<1x128xf32>
    %c0_i32_6 = arith.constant 0 : i32
    %15 = arith.subi %6, %c0_i32_6 : i32
    %16 = vector.broadcast %15 : i32 to vector<1x128xi32>
    %17 = arith.cmpi slt, %7, %16 : vector<1x128xi32>
    %cst_7 = arith.constant 0.000000e+00 : f32
    %18 = vector.shape_cast %17 : vector<1x128xi1> to vector<1x128xi1>
    %19 = vector.broadcast %18 : vector<1x128xi1> to vector<20x128xi1>
    %20 = vector.broadcast %cst_7 : f32 to vector<20x128xf32>
    %21 = arith.select %19, %13, %20 : vector<20x128xi1>, vector<20x128xf32>
    %cst_8 = arith.constant dense<0xFF800000> : vector<128xf32>
    %22 = vector.multi_reduction <maximumf>, %21, %cst_8 [0] : vector<20x128xf32> to vector<128xf32>
    %23 = vector.shape_cast %22 : vector<128xf32> to vector<1x128xf32>
    %24 = vector.broadcast %23 : vector<1x128xf32> to vector<20x128xf32>
    %25 = arith.subf %21, %24 : vector<20x128xf32>
    %26 = math.exp %25 : vector<20x128xf32>
    %cst_9 = arith.constant dense<0.000000e+00> : vector<128xf32>
    %27 = vector.multi_reduction <add>, %26, %cst_9 [0] : vector<20x128xf32> to vector<128xf32>
    %28 = vector.shape_cast %27 : vector<128xf32> to vector<1x128xf32>
    %29 = arith.mulf %26, %10 : vector<20x128xf32>
    %cst_10 = arith.constant dense<0.000000e+00> : vector<128xf32>
    %30 = vector.multi_reduction <add>, %29, %cst_10 [0] : vector<20x128xf32> to vector<128xf32>
    %31 = vector.shape_cast %30 : vector<128xf32> to vector<1x128xf32>
    %32 = arith.divf %31, %28 : vector<1x128xf32>
    %cst_11 = arith.constant 0.000000e+00 : f32
    %33 = vector.broadcast %cst_11 : f32 to vector<1x128xf32>
    %34 = arith.select %17, %32, %33 : vector<1x128xi1>, vector<1x128xf32>
    %cst_12 = arith.constant 0.000000e+00 : f32
    %35 = vector.broadcast %cst_12 : f32 to vector<1x128xf32>
    %36 = arith.select %17, %14, %35 : vector<1x128xi1>, vector<1x128xf32>
    %37 = arith.addf %11, %34 : vector<1x128xf32>
    %38 = arith.addf %11, %36 : vector<1x128xf32>
    %39 = arith.mulf %34, %34 : vector<1x128xf32>
    %40 = arith.addf %11, %39 : vector<1x128xf32>
    %41 = arith.mulf %36, %36 : vector<1x128xf32>
    %42 = arith.addf %11, %41 : vector<1x128xf32>
    %43 = arith.mulf %34, %36 : vector<1x128xf32>
    %44 = arith.addf %11, %43 : vector<1x128xf32>
    %c128 = arith.constant 128 : index
    %c0_13 = arith.constant 0 : index
    %45 = vector.load %arg2[%c128, %c0_13] : memref<384x20xf32, #tpu.memory_space<vmem>>, vector<128x20xf32>
    %46 = tpu.transpose %45, [1, 0] : vector<128x20xf32> -> vector<20x128xf32>
    %c0_14 = arith.constant 0 : index
    %c128_15 = arith.constant 128 : index
    %47 = vector.load %arg3[%c0_14, %c128_15] : memref<1x384xf32, #tpu.memory_space<vmem>>, vector<1x128xf32>
    %c128_i32 = arith.constant 128 : i32
    %48 = arith.subi %6, %c128_i32 : i32
    %49 = vector.broadcast %48 : i32 to vector<1x128xi32>
    %50 = arith.cmpi slt, %7, %49 : vector<1x128xi32>
    %cst_16 = arith.constant 0.000000e+00 : f32
    %51 = vector.shape_cast %50 : vector<1x128xi1> to vector<1x128xi1>
    %52 = vector.broadcast %51 : vector<1x128xi1> to vector<20x128xi1>
    %53 = vector.broadcast %cst_16 : f32 to vector<20x128xf32>
    %54 = arith.select %52, %46, %53 : vector<20x128xi1>, vector<20x128xf32>
    %cst_17 = arith.constant dense<0xFF800000> : vector<128xf32>
    %55 = vector.multi_reduction <maximumf>, %54, %cst_17 [0] : vector<20x128xf32> to vector<128xf32>
    %56 = vector.shape_cast %55 : vector<128xf32> to vector<1x128xf32>
    %57 = vector.broadcast %56 : vector<1x128xf32> to vector<20x128xf32>
    %58 = arith.subf %54, %57 : vector<20x128xf32>
    %59 = math.exp %58 : vector<20x128xf32>
    %cst_18 = arith.constant dense<0.000000e+00> : vector<128xf32>
    %60 = vector.multi_reduction <add>, %59, %cst_18 [0] : vector<20x128xf32> to vector<128xf32>
    %61 = vector.shape_cast %60 : vector<128xf32> to vector<1x128xf32>
    %62 = arith.mulf %59, %10 : vector<20x128xf32>
    %cst_19 = arith.constant dense<0.000000e+00> : vector<128xf32>
    %63 = vector.multi_reduction <add>, %62, %cst_19 [0] : vector<20x128xf32> to vector<128xf32>
    %64 = vector.shape_cast %63 : vector<128xf32> to vector<1x128xf32>
    %65 = arith.divf %64, %61 : vector<1x128xf32>
    %cst_20 = arith.constant 0.000000e+00 : f32
    %66 = vector.broadcast %cst_20 : f32 to vector<1x128xf32>
    %67 = arith.select %50, %65, %66 : vector<1x128xi1>, vector<1x128xf32>
    %cst_21 = arith.constant 0.000000e+00 : f32
    %68 = vector.broadcast %cst_21 : f32 to vector<1x128xf32>
    %69 = arith.select %50, %47, %68 : vector<1x128xi1>, vector<1x128xf32>
    %70 = arith.addf %37, %67 : vector<1x128xf32>
    %71 = arith.addf %38, %69 : vector<1x128xf32>
    %72 = arith.mulf %67, %67 : vector<1x128xf32>
    %73 = arith.addf %40, %72 : vector<1x128xf32>
    %74 = arith.mulf %69, %69 : vector<1x128xf32>
    %75 = arith.addf %42, %74 : vector<1x128xf32>
    %76 = arith.mulf %67, %69 : vector<1x128xf32>
    %77 = arith.addf %44, %76 : vector<1x128xf32>
    %c256 = arith.constant 256 : index
    %c0_22 = arith.constant 0 : index
    %78 = vector.load %arg2[%c256, %c0_22] : memref<384x20xf32, #tpu.memory_space<vmem>>, vector<128x20xf32>
    %79 = tpu.transpose %78, [1, 0] : vector<128x20xf32> -> vector<20x128xf32>
    %c0_23 = arith.constant 0 : index
    %c256_24 = arith.constant 256 : index
    %80 = vector.load %arg3[%c0_23, %c256_24] : memref<1x384xf32, #tpu.memory_space<vmem>>, vector<1x128xf32>
    %c256_i32 = arith.constant 256 : i32
    %81 = arith.subi %6, %c256_i32 : i32
    %82 = vector.broadcast %81 : i32 to vector<1x128xi32>
    %83 = arith.cmpi slt, %7, %82 : vector<1x128xi32>
    %cst_25 = arith.constant 0.000000e+00 : f32
    %84 = vector.shape_cast %83 : vector<1x128xi1> to vector<1x128xi1>
    %85 = vector.broadcast %84 : vector<1x128xi1> to vector<20x128xi1>
    %86 = vector.broadcast %cst_25 : f32 to vector<20x128xf32>
    %87 = arith.select %85, %79, %86 : vector<20x128xi1>, vector<20x128xf32>
    %cst_26 = arith.constant dense<0xFF800000> : vector<128xf32>
    %88 = vector.multi_reduction <maximumf>, %87, %cst_26 [0] : vector<20x128xf32> to vector<128xf32>
    %89 = vector.shape_cast %88 : vector<128xf32> to vector<1x128xf32>
    %90 = vector.broadcast %89 : vector<1x128xf32> to vector<20x128xf32>
    %91 = arith.subf %87, %90 : vector<20x128xf32>
    %92 = math.exp %91 : vector<20x128xf32>
    %cst_27 = arith.constant dense<0.000000e+00> : vector<128xf32>
    %93 = vector.multi_reduction <add>, %92, %cst_27 [0] : vector<20x128xf32> to vector<128xf32>
    %94 = vector.shape_cast %93 : vector<128xf32> to vector<1x128xf32>
    %95 = arith.mulf %92, %10 : vector<20x128xf32>
    %cst_28 = arith.constant dense<0.000000e+00> : vector<128xf32>
    %96 = vector.multi_reduction <add>, %95, %cst_28 [0] : vector<20x128xf32> to vector<128xf32>
    %97 = vector.shape_cast %96 : vector<128xf32> to vector<1x128xf32>
    %98 = arith.divf %97, %94 : vector<1x128xf32>
    %cst_29 = arith.constant 0.000000e+00 : f32
    %99 = vector.broadcast %cst_29 : f32 to vector<1x128xf32>
    %100 = arith.select %83, %98, %99 : vector<1x128xi1>, vector<1x128xf32>
    %cst_30 = arith.constant 0.000000e+00 : f32
    %101 = vector.broadcast %cst_30 : f32 to vector<1x128xf32>
    %102 = arith.select %83, %80, %101 : vector<1x128xi1>, vector<1x128xf32>
    %103 = arith.addf %70, %100 : vector<1x128xf32>
    %104 = arith.addf %71, %102 : vector<1x128xf32>
    %105 = arith.mulf %100, %100 : vector<1x128xf32>
    %106 = arith.addf %73, %105 : vector<1x128xf32>
    %107 = arith.mulf %102, %102 : vector<1x128xf32>
    %108 = arith.addf %75, %107 : vector<1x128xf32>
    %109 = arith.mulf %100, %102 : vector<1x128xf32>
    %110 = arith.addf %77, %109 : vector<1x128xf32>
    %c0_31 = arith.constant 0 : index
    %c0_32 = arith.constant 0 : index
    %111 = vector.load %arg5[%c0_31, %c0_32] : memref<8x128xf32, #tpu.memory_space<vmem>>, vector<1x128xf32>
    %112 = arith.addf %111, %103 : vector<1x128xf32>
    %c0_33 = arith.constant 0 : index
    %c0_34 = arith.constant 0 : index
    %113 = vector.load %arg5[%c0_33, %c0_34] : memref<8x128xf32, #tpu.memory_space<vmem>>, vector<1x128xf32>
    tpu.vector_store %arg5[%c0_33, %c0_34], %112 {strides = array<i32>} : memref<8x128xf32, #tpu.memory_space<vmem>>, vector<1x128xf32>,
    %c1 = arith.constant 1 : index
    %c0_35 = arith.constant 0 : index
    %114 = vector.load %arg5[%c1, %c0_35] : memref<8x128xf32, #tpu.memory_space<vmem>>, vector<1x128xf32>
    %115 = arith.addf %114, %104 : vector<1x128xf32>
    %c1_36 = arith.constant 1 : index
    %c0_37 = arith.constant 0 : index
    %116 = vector.load %arg5[%c1_36, %c0_37] : memref<8x128xf32, #tpu.memory_space<vmem>>, vector<1x128xf32>
    tpu.vector_store %arg5[%c1_36, %c0_37], %115 {strides = array<i32>} : memref<8x128xf32, #tpu.memory_space<vmem>>, vector<1x128xf32>,
    %c2 = arith.constant 2 : index
    %c0_38 = arith.constant 0 : index
    %117 = vector.load %arg5[%c2, %c0_38] : memref<8x128xf32, #tpu.memory_space<vmem>>, vector<1x128xf32>
    %118 = arith.addf %117, %106 : vector<1x128xf32>
    %c2_39 = arith.constant 2 : index
    %c0_40 = arith.constant 0 : index
    %119 = vector.load %arg5[%c2_39, %c0_40] : memref<8x128xf32, #tpu.memory_space<vmem>>, vector<1x128xf32>
    tpu.vector_store %arg5[%c2_39, %c0_40], %118 {strides = array<i32>} : memref<8x128xf32, #tpu.memory_space<vmem>>, vector<1x128xf32>,
    %c3 = arith.constant 3 : index
    %c0_41 = arith.constant 0 : index
    %120 = vector.load %arg5[%c3, %c0_41] : memref<8x128xf32, #tpu.memory_space<vmem>>, vector<1x128xf32>
    %121 = arith.addf %120, %108 : vector<1x128xf32>
    %c3_42 = arith.constant 3 : index
    %c0_43 = arith.constant 0 : index
    %122 = vector.load %arg5[%c3_42, %c0_43] : memref<8x128xf32, #tpu.memory_space<vmem>>, vector<1x128xf32>
    tpu.vector_store %arg5[%c3_42, %c0_43], %121 {strides = array<i32>} : memref<8x128xf32, #tpu.memory_space<vmem>>, vector<1x128xf32>,
    %c4 = arith.constant 4 : index
    %c0_44 = arith.constant 0 : index
    %123 = vector.load %arg5[%c4, %c0_44] : memref<8x128xf32, #tpu.memory_space<vmem>>, vector<1x128xf32>
    %124 = arith.addf %123, %110 : vector<1x128xf32>
    %c4_45 = arith.constant 4 : index
    %c0_46 = arith.constant 0 : index
    %125 = vector.load %arg5[%c4_45, %c0_46] : memref<8x128xf32, #tpu.memory_space<vmem>>, vector<1x128xf32>
    tpu.vector_store %arg5[%c4_45, %c0_46], %124 {strides = array<i32>} : memref<8x128xf32, #tpu.memory_space<vmem>>, vector<1x128xf32>,
    return
  }
  func.func @transform_0(%arg0: i32, %arg1: i32) -> (i32, i32) {
    %c1_i32 = arith.constant 1 : i32
    %0 = arith.muli %arg0, %c1_i32 : i32
    %1 = arith.addi %0, %arg1 : i32
    %c0_i32 = arith.constant 0 : i32
    %2 = arith.minsi %1, %c0_i32 : i32
    %c0_i32_0 = arith.constant 0 : i32
    %c0_i32_1 = arith.constant 0 : i32
    return %2, %c0_i32_0 : i32, i32
  }
  func.func @transform_1(%arg0: i32, %arg1: i32) -> (i32, i32) {
    %c1_i32 = arith.constant 1 : i32
    %0 = arith.muli %arg0, %c1_i32 : i32
    %1 = arith.addi %0, %arg1 : i32
    %c0_i32 = arith.constant 0 : i32
    %2 = arith.minsi %1, %c0_i32 : i32
    %c0_i32_0 = arith.constant 0 : i32
    %c0_i32_1 = arith.constant 0 : i32
    return %c0_i32_0, %2 : i32, i32
  }
  func.func @transform_2(%arg0: i32, %arg1: i32) -> (i32, i32) {
    %c0_i32 = arith.constant 0 : i32
    %c0_i32_0 = arith.constant 0 : i32
    %c0_i32_1 = arith.constant 0 : i32
    return %c0_i32, %c0_i32_0 : i32, i32
  }
  func.func @transform_3(%arg0: i32, %arg1: i32) -> (i32, i32) {
    %c0_i32 = arith.constant 0 : i32
    %c0_i32_0 = arith.constant 0 : i32
    return %arg0, %c0_i32 : i32, i32
  }
}

</mosaic_0001>

<bundles_post_ra>
// kernel: tpu_custom_call.1
= control target key start
LH: loop header
LB: loop body
LE: loop exit
PB: predicated region body
PF: predicated region fallthrough
CT: control target
= control target key end

     0   :  { %8 = vsyncpa [#allocation3], 0  ;;  %s1189_s0 = inlined_call_operand.vmem [shape: f32[300,20], index: 0, kind: input, shape index: {}]   ;;  %s1190_s1 = inlined_call_operand.vmem [shape: f32[1,300], index: 1, kind: input, shape index: {}]   ;;  %s1191_s2 = inlined_call_operand.vmem [shape: f32[20,1], index: 2, kind: input, shape index: {}]   ;;  %s1192_s3 = inlined_call_operand.hbm [shape: f32[16,128], index: 3, kind: output, shape index: {}]  }
   0x1   :  { %10 = vsyncpa [#allocation3 + $0x1], 0  ;;  %s908_s12 = smov 0   ;;  %s910_s13 = smov 0  }
   0x2   :  { %s912_s14 = smov 0   ;;  %s914_s15 = smov 0  }
   0x3   :  { %s916_s16 = smov 0   ;;  %s918_s17 = smov 0  }
   0x4 LB: > { %s711_s18 = sadd.s32 4294967295, %s883_s17   ;;  %s712_s19 = sadd.s32 4294967294, %s883_s17   ;;  %s883_s17 = sphi %s918_s17, %s16_s17   ;;  %s879_s16 = sphi %s916_s16, %s1205_s16   ;;  %s875_s15 = sphi %s914_s15, %s1204_s15   ;;  %s871_s14 = sphi %s912_s14, %s1203_s14   ;;  %s867_s13 = sphi %s910_s13, %s1202_s13   ;;  %s863_s12 = sphi %s908_s12, %s1201_s12  }
   0x5   : > { %s28_s20 = sadd.s32 1, %s879_s16  ;;  %s120_s21 = sadd.s32 1, %s871_s14 }
   0x6   : > { %p30_p0 = scmp.ge.s32.totalorder %s28_s20, 2  ;;  %p130_p1 = scmp.ne.s32.totalorder %s871_s14, %s867_s13 }
   0x7   : > { %p131_p2 = scmp.eq.s32.totalorder %s711_s18, 1  ;;  %p136_p3 = scmp.ne.s32.totalorder %s867_s13, %s863_s12 }
   0x8   : > { %s1207_s20 = smov (%p30_p0, %s28_s20), 0  ;;  %p137_p5 = scmp.eq.s32.totalorder %s712_s19, 1 }
   0x9   : > { %p948_p4 = por %p131_p2, %p130_p1  ;;  %s117_s23 = ssub.s32 %s879_s16, %s1207_s20 }
   0xa   : > { %p715_p6 = scmp.ge.s32.totalorder %s883_s17, 1  ;;  %p118_p7 = scmp.eq.s32.totalorder %s117_s23, 0 }
   0xb   : > { %p955_p8 = por %p137_p5, %p136_p3  ;;  %p191_p9 = scmp.lt.s32.totalorder %s883_s17, 3 }
   0xc   : > { %s961_s25 = scalar_select %p118_p7, %s871_s14, %s120_s21  }
   0xd   : > { %p192_p10 = pnand %p715_p6, %p191_p9 }
   0xe   : > { %v266_v0 = vld [vmem:[%s1191_s2 + $0x10] sm:$0xf] (!%p192_p10)  ;;  %v264_v1 = vld [vmem:[%s1191_s2] sm:$0xff] (!%p192_p10)  ;;  %v885_v2 = vmov (!%p192_p10), 0   ;;  %v265_v3 = vld [vmem:[%s1191_s2 + $0x8] sm:$0xff] (!%p192_p10)  ;;  %p228_p11 = scmp.lt.s32.totalorder (!%p192_p10), %s875_s15, 0  ;;  %v262_v38 = vlaneseq (!%p192_p10) }
   0xf   : > { %195 = sbr.rel (%p192_p10) target bundleno = 333 (0x14d), region = 32  ;;  %780 = vset.pattern.permute.xlu1 (!%p192_p10), %v885_v2  ;;  %779 = vset.pattern.permute.xlu0 (!%p192_p10), %v885_v2  ;;  %s224_s29 = sand.u32 (!%p192_p10), 1, %s867_s13   ;;  %v886_v61 = vmov (!%p192_p10), 0.0   ;;  %vm338_vm3 = vcmask (!%p192_p10), 1043456  }
  0x10   : > { %279 = vperm.xlu1 (!%p192_p10), %780, %v266_v0   ;;  %269 = vperm.xlu0 (!%p192_p10), %779, %v264_v1   ;;  %s260_s18 = smul.u32 (!%p192_p10), 384, %s875_s15  ;;  %v263_v40 = vand.u32 (!%p192_p10), 127, %v262_v38  ;;  %s716_s30 = sshll.u32 (!%p192_p10), %s224_s29, 3 }
  0x11   : > { %s1060_s4 = scalar_lea.vmem (!%p192_p10), [#allocation2], %s716_s30 }
  0x12   : > { %s439_s19 = ssub.s32 (!%p192_p10), 172, %s260_s18  ;;  %s261_s21 = ssub.s32 (!%p192_p10), 300, %s260_s18  ;;  %258 = vst [vmem:[%s1060_s4] sm:$0xff] (!%p192_p10), %v886_v61 }
  0x13   : > { %v440_v41 = vstv (!%p192_p10), %s439_s19  ;;  %v331_v42 = vstv (!%p192_p10), %s261_s21  ;;  %s547_s28 = ssub.s32 (!%p192_p10), 44, %s260_s18 }
  0x14   : > { %274 = vperm.xlu0 (!%p192_p10), %779, %v265_v3   ;;  %vm1023_vm0 = vcmp.lt.s32.totalorder (!%p192_p10), %v263_v40, %v440_v41  ;;  %vm1027_vm1 = vcmp.lt.s32.totalorder (!%p192_p10), %v263_v40, %v331_v42  ;;  %v548_v48 = vstv (!%p192_p10), %s547_s28 }
  0x15   : > { %vm1044_vm2 = vcmp.lt.s32.totalorder (!%p192_p10), %v263_v40, %v548_v48 }
  0x16   : > { %s974_s5 = scalar_select %p228_p11, %s875_s15, 0 }
  0x18   : > { %s230_s6 = smul.u32 48, %s974_s5 }
  0x19   : > { %s246_s11 = smul.u32 3, %s974_s5  ;;  %v609_v1 = vld [vmem:[%s1060_s4 + $0x1] sm:$0x1]  ;;  %v615_v2 = vld [vmem:[%s1060_s4 + $0x3] sm:$0x1]  ;;  %s719_s5 = sshll.u32 %s875_s15, 7 }
  0x1a   : > { %p233_p12 = scmp.lt.s32.totalorder %s230_s6, 37  ;;  %s1138_s9 = scalar_lea.hbm %s1192_s3, %s719_s5 }
  0x1b   : > { %p247_p13 = scmp.lt.s32.totalorder %s246_s11, 2  ;;  %s622_s15 = scalar_lea.sflag [#allocation3], %s224_s29 }
  0x1c   : > { %s1209_s6 = smov (!%p233_p12, %s230_s6), 37 }
  0x1d   : > { %s717_s7 = sshll.u32 %s1209_s6, 3  ;;  %s1211_s11 = smov (!%p247_p13, %s246_s11), 2 }
  0x1e   : > { %s980_s10 = scalar_lea.vmem %s1189_s0, %s717_s7  ;;  %s249_s27 = scalar_lea.vmem %s1190_s1, %s1211_s11 }
  0x1f   : > { %v390_v4 = vld [vmem:[%s980_s10 + $0x80] sm:$0xff]  ;;  %v391_v5 = vld [vmem:[%s980_s10 + $0x88] sm:$0xff]  ;;  %v392_v7 = vld [vmem:[%s980_s10 + $0x90] sm:$0xff]  ;;  %s635_s6 = sshll.u32 %s1060_s4, 4  ;;  %s887_s11 = smov [#allocation2]   ;;  %s1140_s6 = int_to_ptr.vmem [resolvable:$true] %s635_s6 }
  0x20   : > { %v282_v6 = vld [vmem:[%s980_s10] sm:$0xff]  ;;  %v283_v8 = vld [vmem:[%s980_s10 + $0x8] sm:$0xff]  ;;  %v393_v9 = vld [vmem:[%s980_s10 + $0x98] sm:$0xff]  ;;  %s809_s18 = sshll.u32 %s887_s11, 4  ;;  %s810_s18 = int_to_ptr.vmem [resolvable:$false] %s809_s18 }
  0x21   : > { %v284_v10 = vld [vmem:[%s980_s10 + $0x10] sm:$0xff]  ;;  %v394_v11 = vld [vmem:[%s980_s10 + $0xa0] sm:$0xff]  ;;  %v285_v12 = vld [vmem:[%s980_s10 + $0x18] sm:$0xff]  ;;  %s811_s19 = scalar_lea.vmem %s810_s18, 256  ;;  %p812_p3 = scmp.lt.s32.totalorder %s1140_s6, %s810_s18 }
  0x22   : > { %v395_v13 = vld [vmem:[%s980_s10 + $0xa8] sm:$0xff]  ;;  %v286_v14 = vld [vmem:[%s980_s10 + $0x20] sm:$0xff]  ;;  %v396_v15 = vld [vmem:[%s980_s10 + $0xb0] sm:$0xff] }
  0x23   : > { %v287_v16 = vld [vmem:[%s980_s10 + $0x28] sm:$0xff]  ;;  %v397_v17 = vld [vmem:[%s980_s10 + $0xb8] sm:$0xff]  ;;  %v288_v18 = vld [vmem:[%s980_s10 + $0x30] sm:$0xff] }
  0x24   : > { %v398_v19 = vld [vmem:[%s980_s10 + $0xc0] sm:$0xff]  ;;  %v289_v20 = vld [vmem:[%s980_s10 + $0x38] sm:$0xff]  ;;  %v399_v21 = vld [vmem:[%s980_s10 + $0xc8] sm:$0xff] }
  0x25   : > { %v290_v22 = vld [vmem:[%s980_s10 + $0x40] sm:$0xff]  ;;  %v400_v23 = vld [vmem:[%s980_s10 + $0xd0] sm:$0xff]  ;;  %v291_v24 = vld [vmem:[%s980_s10 + $0x48] sm:$0xff] }
  0x26   : > { %v401_v25 = vld [vmem:[%s980_s10 + $0xd8] sm:$0xff]  ;;  %v292_v26 = vld [vmem:[%s980_s10 + $0x50] sm:$0xff]  ;;  %v402_v27 = vld [vmem:[%s980_s10 + $0xe0] sm:$0xff] }
  0x27   : > { %v293_v28 = vld [vmem:[%s980_s10 + $0x58] sm:$0xff]  ;;  %v403_v29 = vld [vmem:[%s980_s10 + $0xe8] sm:$0xff]  ;;  %v294_v30 = vld [vmem:[%s980_s10 + $0x60] sm:$0xff] }
  0x28   : > { %v404_v31 = vld [vmem:[%s980_s10 + $0xf0] sm:$0xff]  ;;  %v295_v32 = vld [vmem:[%s980_s10 + $0x68] sm:$0xff]  ;;  %v405_v33 = vld [vmem:[%s980_s10 + $0xf8] sm:$0xff] }
  0x29   : > { %v296_v34 = vld [vmem:[%s980_s10 + $0x70] sm:$0xff]  ;;  %v498_v35 = vld [vmem:[%s980_s10 + $0x100] sm:$0xff]  ;;  %v297_v36 = vld [vmem:[%s980_s10 + $0x78] sm:$0xff] }
  0x2a   : > { %v499_v37 = vld [vmem:[%s980_s10 + $0x108] sm:$0xff]  ;;  %v500_v39 = vld [vmem:[%s980_s10 + $0x110] sm:$0xff]  ;;  %v501_v43 = vld [vmem:[%s980_s10 + $0x118] sm:$0xff] }
  0x2b   : > { %v438_v44 = vld [vmem:[%s249_s27 + $0x1] sm:$0x1]  ;;  %v330_v45 = vld [vmem:[%s249_s27] sm:$0x1]  ;;  %v546_v54 = vld [vmem:[%s249_s27 + $0x2] sm:$0x1] }
  0x2c   : > { %v1033_v49 = vsel %vm1023_vm0, %v438_v44, 0.0  ;;  %v1037_v50 = vsel %vm1027_vm1, %v330_v45, 0.0  ;;  %v502_v51 = vld [vmem:[%s980_s10 + $0x120] sm:$0xff]  ;;  %v1051_v56 = vsel %vm1044_vm2, %v546_v54, 0.0  ;;  %v503_v57 = vld [vmem:[%s980_s10 + $0x128] sm:$0xff]  ;;  %v504_v62 = vld [vmem:[%s980_s10 + $0x130] sm:$0xff] }
  0x2d   : > { %v494_v52 = vmul.f32 %v1033_v49, %v1033_v49  ;;  %v386_v53 = vmul.f32 %v1037_v50, %v1037_v50  ;;  %v491_v58 = vadd.f32 %v1033_v49, %v1037_v50  ;;  %v602_v60 = vmul.f32 %v1051_v56, %v1051_v56  ;;  %v505_v3 = vld [vmem:[%s980_s10 + $0x138] sm:$0xff] }
  0x2f   : > { %v495_v59 = vadd.f32 %v494_v52, %v386_v53  ;;  %v599_v63 = vadd.f32 %v1051_v56, %v491_v58 }
  0x31   : > { %v603_v0 = vadd.f32 %v602_v60, %v495_v59 }
  0x32   : > { %406 = vxpose.xlu0.b32.start [1/16] (narrow) %v390_v4, 24  ;;  %v610_v4 = vadd.f32 %v609_v1, %v599_v63 }
  0x34   : > { %611 = vst [vmem:[%s1060_s4 + $0x1] sm:$0x1] %v610_v4 }
  0x36   : > { %407 = vxpose.xlu0.b32.cont [2/16] (narrow) %v391_v5, 24  ;;  %v616_v5 = vadd.f32 %v615_v2, %v603_v0 }
  0x38   : > { %617 = vst [vmem:[%s1060_s4 + $0x3] sm:$0x1] %v616_v5 }
  0x39   : > { %298 = vxpose.xlu1.b32.start [1/16] (narrow) %v282_v6, 24  ;;  %v506_v6 = vld [vmem:[%s980_s10 + $0x140] sm:$0xff] }
  0x3a   : > { %408 = vxpose.xlu0.b32.cont [3/16] (narrow) %v392_v7, 24  ;;  %v507_v7 = vld [vmem:[%s980_s10 + $0x148] sm:$0xff] }
  0x3d   : > { %299 = vxpose.xlu1.b32.cont [2/16] (narrow) %v283_v8, 24  ;;  %v508_v8 = vld [vmem:[%s980_s10 + $0x150] sm:$0xff] }
  0x3e   : > { %409 = vxpose.xlu0.b32.cont [4/16] (narrow) %v393_v9, 24  ;;  %v509_v9 = vld [vmem:[%s980_s10 + $0x158] sm:$0xff] }
  0x41   : > { %300 = vxpose.xlu1.b32.cont [3/16] (narrow) %v284_v10, 24  ;;  %v510_v10 = vld [vmem:[%s980_s10 + $0x160] sm:$0xff] }
  0x42   : > { %410 = vxpose.xlu0.b32.cont [5/16] (narrow) %v394_v11, 24  ;;  %v511_v11 = vld [vmem:[%s980_s10 + $0x168] sm:$0xff] }
  0x45   : > { %301 = vxpose.xlu1.b32.cont [4/16] (narrow) %v285_v12, 24  ;;  %v512_v12 = vld [vmem:[%s980_s10 + $0x170] sm:$0xff] }
  0x46   : > { %411 = vxpose.xlu0.b32.cont [6/16] (narrow) %v395_v13, 24  ;;  %v513_v13 = vld [vmem:[%s980_s10 + $0x178] sm:$0xff]  ;;  %s805_s10 = scalar_lea.vmem %s1140_s6, 128 }
  0x47   : > { %p806_p0 = scmp.ne.s32.totalorder %s1140_s6, %s805_s10  ;;  %p813_p5 = scmp.lt.s32.totalorder %s811_s19, %s805_s10 }
  0x49   : > { %302 = vxpose.xlu1.b32.cont [5/16] (narrow) %v286_v14, 24  ;;  %p807_p1 = pnand %p806_p0, %p948_p4  ;;  %p814_p6 = por %p813_p5, %p812_p3 }
  0x4a   : > { %412 = vxpose.xlu0.b32.cont [7/16] (narrow) %v396_v15, 24 }
  0x4b   : > { %p808_p2 = pneg %p807_p1 }
  0x4d   : > { %303 = vxpose.xlu1.b32.cont [6/16] (narrow) %v287_v16, 24  ;;  %p815_p7 = pnand %p814_p6, %p808_p2 }
  0x4e   : > { %413 = vxpose.xlu0.b32.cont [8/16] (narrow) %v397_v17, 24 }
  0x51   : > { %304 = vxpose.xlu1.b32.cont [7/16] (narrow) %v288_v18, 24 }
  0x52   : > { %414 = vxpose.xlu0.b32.cont [9/16] (narrow) %v398_v19, 24 }
  0x55   : > { %305 = vxpose.xlu1.b32.cont [8/16] (narrow) %v289_v20, 24 }
  0x56   : > { %415 = vxpose.xlu0.b32.cont [10/16] (narrow) %v399_v21, 24 }
  0x59   : > { %306 = vxpose.xlu1.b32.cont [9/16] (narrow) %v290_v22, 24 }
  0x5a   : > { %416 = vxpose.xlu0.b32.cont [11/16] (narrow) %v400_v23, 24 }
  0x5d   : > { %307 = vxpose.xlu1.b32.cont [10/16] (narrow) %v291_v24, 24 }
  0x5e   : > { %417 = vxpose.xlu0.b32.cont [12/16] (narrow) %v401_v25, 24 }
  0x61   : > { %308 = vxpose.xlu1.b32.cont [11/16] (narrow) %v292_v26, 24 }
  0x62   : > { %418 = vxpose.xlu0.b32.cont [13/16] (narrow) %v402_v27, 24 }
  0x65   : > { %309 = vxpose.xlu1.b32.cont [12/16] (narrow) %v293_v28, 24 }
  0x66   : > { %419 = vxpose.xlu0.b32.cont [14/16] (narrow) %v403_v29, 24 }
  0x69   : > { %310 = vxpose.xlu1.b32.cont [13/16] (narrow) %v294_v30, 24 }
  0x6a   : > { %420 = vxpose.xlu0.b32.cont [15/16] (narrow) %v404_v31, 24 }
  0x6d   : > { %311 = vxpose.xlu1.b32.cont [14/16] (narrow) %v295_v32, 24 }
  0x6e   : > { %421 = vxpose.xlu0.b32.end [16/16] (narrow) %v405_v33, 24 }
  0x71   : > { %312 = vxpose.xlu1.b32.cont [15/16] (narrow) %v296_v34, 24 }
  0x72   : > { %514 = vxpose.xlu0.b32.start [1/16] (narrow) %v498_v35, 24 }
  0x75   : > { %313 = vxpose.xlu1.b32.end [16/16] (narrow) %v297_v36, 24 }
  0x76   : > { %515 = vxpose.xlu0.b32.cont [2/16] (narrow) %v499_v37, 24 }
  0x7a   : > { %516 = vxpose.xlu0.b32.cont [3/16] (narrow) %v500_v39, 24 }
  0x7e   : > { %517 = vxpose.xlu0.b32.cont [4/16] (narrow) %v501_v43, 24 }
  0x82   : > { %518 = vxpose.xlu0.b32.cont [5/16] (narrow) %v502_v51, 24 }
  0x86   : > { %519 = vxpose.xlu0.b32.cont [6/16] (narrow) %v503_v57, 24 }
  0x8a   : > { %520 = vxpose.xlu0.b32.cont [7/16] (narrow) %v504_v62, 24 }
  0x8e   : > { %521 = vxpose.xlu0.b32.cont [8/16] (narrow) %v505_v3, 24 }
  0x8f   : > { %v1078_v14 = vpop.permute.xlu0 %269  ;;  %v1080_v15 = vpop.permute.xlu1 %279 }
  0x92   : > { %522 = vxpose.xlu0.b32.cont [9/16] (narrow) %v506_v6, 24 }
  0x93   : > { %v1082_v16 = vpop.permute.xlu0 %274 }
  0x96   : > { %523 = vxpose.xlu0.b32.cont [10/16] (narrow) %v507_v7, 24 }
  0x9a   : > { %524 = vxpose.xlu0.b32.cont [11/16] (narrow) %v508_v8, 24 }
  0x9e   : > { %525 = vxpose.xlu0.b32.cont [12/16] (narrow) %v509_v9, 24 }
  0xa2   : > { %526 = vxpose.xlu0.b32.cont [13/16] (narrow) %v510_v10, 24 }
  0xa6   : > { %527 = vxpose.xlu0.b32.cont [14/16] (narrow) %v511_v11, 24 }
  0xaa   : > { %528 = vxpose.xlu0.b32.cont [15/16] (narrow) %v512_v12, 24 }
  0xae   : > { %529 = vxpose.xlu0.b32.end [16/16] (narrow) %v513_v13, 24 }
  0xb2   : > { %v422_v17 = vpop.trf.xlu0 }
  0xb3   : > { %v444_v23 = vsel %vm1023_vm0, %v422_v17, 0.0 }
  0xb6   : > { %v423_v19 = vpop.trf.xlu0 }
  0xb7   : > { %v445_v24 = vsel %vm1023_vm0, %v423_v19, 0.0 }
  0xb8   : > { %v448_v29 = vmax.f32 %v444_v23, %v445_v24 }
  0xb9   : > { %v314_v18 = vpop.trf.xlu1 }
  0xba   : > { %v424_v21 = vpop.trf.xlu0  ;;  %v335_v25 = vsel %vm1027_vm1, %v314_v18, 0.0 }
  0xbb   : > { %v446_v26 = vsel %vm1023_vm0, %v424_v21, 0.0 }
  0xbc   : > { %v447_v30 = vsel %vm338_vm3, %v446_v26, -inf }
  0xbd   : > { %v315_v20 = vpop.trf.xlu1  ;;  %v449_v33 = vmax.f32 %v448_v29, %v447_v30 }
  0xbe   : > { %v336_v27 = vsel %vm1027_vm1, %v315_v20, 0.0 }
  0xbf   : > { %v340_v31 = vmax.f32 %v335_v25, %v336_v27  ;;  %v450_v35 = vrot.slane %v449_v33, 4 }
  0xc1   : > { %v316_v22 = vpop.trf.xlu1  ;;  %v451_v37 = vmax.f32 %v449_v33, %v450_v35 }
  0xc2   : > { %v337_v28 = vsel %vm1027_vm1, %v316_v22, 0.0 }
  0xc3   : > { %v339_v32 = vsel %vm338_vm3, %v337_v28, -inf  ;;  %v452_v39 = vrot.slane %v451_v37, 2 }
  0xc4   : > { %v341_v34 = vmax.f32 %v340_v31, %v339_v32 }
  0xc5   : > { %v453_v41 = vmax.f32 %v451_v37, %v452_v39 }
  0xc6   : > { %v342_v36 = vrot.slane %v341_v34, 4 }
  0xc7   : > { %v454_v43 = vrot.slane %v453_v41, 1 }
  0xc8   : > { %v343_v38 = vmax.f32 %v341_v34, %v342_v36 }
  0xc9   : > { %v455_v45 = vmax.f32 %v453_v41, %v454_v43 }
  0xca   : > { %v344_v40 = vrot.slane %v343_v38, 2 }
  0xcb   : > { %v456_v51 = vsub.f32 %v444_v23, %v455_v45  ;;  %v457_v57 = vsub.f32 %v445_v24, %v455_v45  ;;  %v458_v59 = vsub.f32 %v446_v26, %v455_v45 }
  0xcc   : > { %v345_v42 = vmax.f32 %v343_v38, %v344_v40 }
  0xcd   : > { %v459_v58 = vmul.f32 1.442695, %v456_v51  ;;  %v461_v63 = vmul.f32 1.442695, %v457_v57  ;;  %v463_v0 = vmul.f32 1.442695, %v458_v59 }
  0xce   : > { %v346_v44 = vrot.slane %v345_v42, 1 }
  0xcf   : > { %781 = vpow2.f32 %v459_v58 }
  0xd0   : > { %v347_v48 = vmax.f32 %v345_v42, %v346_v44 }
  0xd2   : > { %v348_v52 = vsub.f32 %v335_v25, %v347_v48  ;;  %v349_v53 = vsub.f32 %v336_v27, %v347_v48  ;;  %v350_v54 = vsub.f32 %v337_v28, %v347_v48 }
  0xd4   : > { %v351_v60 = vmul.f32 1.442695, %v348_v52  ;;  %v353_v61 = vmul.f32 1.442695, %v349_v53  ;;  %v355_v62 = vmul.f32 1.442695, %v350_v54 }
  0xd6   : > { %783 = vpow2.f32 %v351_v60 }
  0xd7   : > { %785 = vpow2.f32 %v353_v61 }
  0xd8   : > { %787 = vpow2.f32 %v355_v62 }
  0xd9   : > { %789 = vpow2.f32 %v461_v63  ;;  %v782_v6 = vpop.eup %781 }
  0xda   : > { %791 = vpow2.f32 %v463_v0  ;;  %v474_v38 = vmul.f32 %v782_v6, %v1078_v14 }
  0xe0   : > { %v784_v9 = vpop.eup %783 }
  0xe1   : > { %v786_v11 = vpop.eup %785  ;;  %v366_v33 = vmul.f32 %v784_v9, %v1078_v14 }
  0xe2   : > { %v788_v13 = vpop.eup %787  ;;  %v357_v20 = vadd.f32 %v786_v11, %v784_v9  ;;  %v367_v34 = vmul.f32 %v786_v11, %v1082_v16 }
  0xe3   : > { %v790_v17 = vpop.eup %789  ;;  %v358_v21 = vsel %vm338_vm3, %v788_v13, 0.0  ;;  %v368_v40 = vmul.f32 %v788_v13, %v1080_v15 }
  0xe4   : > { %v792_v19 = vpop.eup %791  ;;  %v465_v23 = vadd.f32 %v790_v17, %v782_v6  ;;  %v359_v26 = vadd.f32 %v358_v21, %v357_v20  ;;  %v475_v41 = vmul.f32 %v790_v17, %v1082_v16  ;;  %v369_v51 = vadd.f32 %v367_v34, %v366_v33 }
  0xe5   : > { %v466_v24 = vsel %vm338_vm3, %v792_v19, 0.0  ;;  %v476_v48 = vmul.f32 %v792_v19, %v1080_v15  ;;  %v370_v53 = vsel %vm338_vm3, %v368_v40, 0.0 }
  0xe6   : > { %v467_v28 = vadd.f32 %v466_v24, %v465_v23  ;;  %v360_v30 = vrot.slane %v359_v26, 4  ;;  %v477_v54 = vadd.f32 %v475_v41, %v474_v38  ;;  %v371_v59 = vadd.f32 %v370_v53, %v369_v51 }
  0xe7   : > { %v478_v58 = vsel %vm338_vm3, %v476_v48, 0.0 }
  0xe8   : > { %v468_v32 = vrot.slane %v467_v28, 4  ;;  %v361_v39 = vadd.f32 %v360_v30, %v359_v26  ;;  %v479_v61 = vadd.f32 %v478_v58, %v477_v54  ;;  %v372_v63 = vrot.slane %v371_v59, 4  ;;  %v606_v58 = vld [vmem:[%s1060_s4] sm:$0x1] }
  0xea   : > { %v469_v45 = vadd.f32 %v468_v32, %v467_v28  ;;  %v362_v52 = vrot.slane %v361_v39, 2 }
  0xec   : > { %v470_v57 = vrot.slane %v469_v45, 2  ;;  %v363_v60 = vadd.f32 %v362_v52, %v361_v39 }
  0xee   : > { %v471_v62 = vadd.f32 %v470_v57, %v469_v45  ;;  %v364_v0 = vrot.slane %v363_v60, 1 }
  0xf2   : > { %v530_v1 = vpop.trf.xlu0 }
  0xf3   : > { %v552_v4 = vsel %vm1044_vm2, %v530_v1, 0.0 }
  0xf6   : > { %v531_v2 = vpop.trf.xlu0 }
  0xf7   : > { %v553_v3 = vsel %vm1044_vm2, %v531_v2, 0.0  ;;  %v480_v2 = vrot.slane %v479_v61, 4 }
  0xf8   : > { %v556_v7 = vmax.f32 %v552_v4, %v553_v3 }
  0xf9   : > { %v481_v13 = vadd.f32 %v480_v2, %v479_v61 }
  0xfa   : > { %v532_v5 = vpop.trf.xlu0 }
  0xfb   : > { %v554_v8 = vsel %vm1044_vm2, %v532_v5, 0.0 }
  0xfc   : > { %v555_v10 = vsel %vm338_vm3, %v554_v8, -inf }
  0xfd   : > { %v557_v12 = vmax.f32 %v556_v7, %v555_v10  ;;  %v373_v7 = vadd.f32 %v372_v63, %v371_v59  ;;  %v365_v10 = vadd.f32 %v364_v0, %v363_v60  ;;  %v618_v63 = vld [vmem:[%s1060_s4 + $0x4] sm:$0x1] }
  0xff   : > { %v558_v18 = vrot.slane %v557_v12, 4  ;;  %v374_v21 = vrot.slane %v373_v7, 2 }
 0x101   : > { %v559_v22 = vmax.f32 %v557_v12, %v558_v18 }
 0x103   : > { %v560_v25 = vrot.slane %v559_v22, 2 }
 0x105   : > { %v561_v27 = vmax.f32 %v559_v22, %v560_v25 }
 0x107   : > { %v562_v29 = vrot.slane %v561_v27, 1 }
 0x109   : > { %v563_v31 = vmax.f32 %v561_v27, %v562_v29 }
 0x10b   : > { %v564_v35 = vsub.f32 %v552_v4, %v563_v31  ;;  %v565_v36 = vsub.f32 %v553_v3, %v563_v31  ;;  %v566_v37 = vsub.f32 %v554_v8, %v563_v31  ;;  %v472_v4 = vrot.slane %v471_v62, 1 }
 0x10d   : > { %v567_v42 = vmul.f32 1.442695, %v564_v35  ;;  %v569_v43 = vmul.f32 1.442695, %v565_v36  ;;  %v571_v44 = vmul.f32 1.442695, %v566_v37  ;;  %v473_v19 = vadd.f32 %v472_v4, %v471_v62 }
 0x10f   : > { %793 = vpow2.f32 %v567_v42 }
 0x110   : > { %795 = vpow2.f32 %v569_v43 }
 0x111   : > { %797 = vpow2.f32 %v571_v44 }
 0x112   : > { %799 = vrcp.f32 %v365_v10 }
 0x113   : > { %801 = vrcp.f32 %v473_v19 }
 0x119   : > { %v794_v1 = vpop.eup %793 }
 0x11a   : > { %v796_v3 = vpop.eup %795  ;;  %v582_v5 = vmul.f32 %v794_v1, %v1078_v14  ;;  %v482_v14 = vrot.slane %v481_v13, 2 }
 0x11b   : > { %v798_v6 = vpop.eup %797  ;;  %v573_v8 = vadd.f32 %v796_v3, %v794_v1  ;;  %v583_v9 = vmul.f32 %v796_v3, %v1082_v16  ;;  %v375_v16 = vadd.f32 %v374_v21, %v373_v7 }
 0x11c   : > { %v574_v11 = vsel %vm338_vm3, %v798_v6, 0.0  ;;  %v584_v12 = vmul.f32 %v798_v6, %v1080_v15  ;;  %v483_v28 = vadd.f32 %v482_v14, %v481_v13  ;;  %v800_v34 = vpop.eup %799 }
 0x11d   : > { %v575_v17 = vadd.f32 %v574_v11, %v573_v8  ;;  %v585_v18 = vadd.f32 %v583_v9, %v582_v5  ;;  %v376_v15 = vrot.slane %v375_v16, 1  ;;  %v802_v36 = vpop.eup %801 }
 0x11e   : > { %v586_v20 = vsel %vm338_vm3, %v584_v12, 0.0  ;;  %v484_v32 = vrot.slane %v483_v28, 1 }
 0x11f   : > { %v576_v22 = vrot.slane %v575_v17, 4  ;;  %v587_v23 = vadd.f32 %v586_v20, %v585_v18  ;;  %v377_v35 = vadd.f32 %v376_v15, %v375_v16 }
 0x120   : > { %v485_v38 = vadd.f32 %v484_v32, %v483_v28 }
 0x121   : > { %v577_v24 = vadd.f32 %v576_v22, %v575_v17  ;;  %v588_v25 = vrot.slane %v587_v23, 4  ;;  %v379_v39 = vmul.f32 %v800_v34, %v377_v35 }
 0x122   : > { %v487_v40 = vmul.f32 %v802_v36, %v485_v38 }
 0x123   : > { %v578_v26 = vrot.slane %v577_v24, 2  ;;  %v589_v27 = vadd.f32 %v588_v25, %v587_v23  ;;  %v380_v42 = vsel %vm1027_vm1, %v379_v39, 0.0 }
 0x124   : > { %v488_v43 = vsel %vm1023_vm0, %v487_v40, 0.0  ;;  %v384_v44 = vmul.f32 %v380_v42, %v380_v42  ;;  %v388_v51 = vmul.f32 %v1037_v50, %v380_v42  ;;  %v612_v50 = vld [vmem:[%s1060_s4 + $0x2] sm:$0x1] }
 0x125   : > { %v579_v29 = vadd.f32 %v578_v26, %v577_v24  ;;  %v590_v31 = vrot.slane %v589_v27, 2  ;;  %v492_v52 = vmul.f32 %v488_v43, %v488_v43  ;;  %v496_v54 = vmul.f32 %v1033_v49, %v488_v43 }
 0x126   : > { %v490_v57 = vadd.f32 %v488_v43, %v380_v42 }
 0x127   : > { %v580_v30 = vrot.slane %v579_v29, 1  ;;  %v591_v37 = vadd.f32 %v590_v31, %v589_v27  ;;  %v493_v46 = vadd.f32 %v492_v52, %v384_v44  ;;  %v497_v59 = vadd.f32 %v496_v54, %v388_v51 }
 0x129   : > { %v581_v33 = vadd.f32 %v580_v30, %v579_v29  ;;  %v592_v41 = vrot.slane %v591_v37, 1 }
 0x12b   : > { %803 = vrcp.f32 %v581_v33  ;;  %v593_v45 = vadd.f32 %v592_v41, %v591_v37 }
 0x135   : > { %v804_v48 = vpop.eup %803 }
 0x136   : > { %v595_v53 = vmul.f32 %v804_v48, %v593_v45 }
 0x138   : > { %v596_v47 = vsel %vm1044_vm2, %v595_v53, 0.0 }
 0x139   : > { %v598_v60 = vadd.f32 %v596_v47, %v490_v57  ;;  %v600_v61 = vmul.f32 %v596_v47, %v596_v47  ;;  %v604_v62 = vmul.f32 %v1051_v56, %v596_v47 }
 0x13b   : > { %v601_v49 = vadd.f32 %v600_v61, %v493_v46  ;;  %v605_v0 = vadd.f32 %v604_v62, %v497_v59  ;;  %v607_v1 = vadd.f32 %v606_v58, %v598_v60 }
 0x13d   : > { %608 = vst [vmem:[%s1060_s4] sm:$0x1] %v607_v1  ;;  %v613_v55 = vadd.f32 %v612_v50, %v601_v49  ;;  %v619_v2 = vadd.f32 %v618_v63, %v605_v0 }
 0x13f   : > { %614 = vst [vmem:[%s1060_s4 + $0x2] sm:$0x1] %v613_v55  ;;  %620 = vst [vmem:[%s1060_s4 + $0x4] sm:$0x1] %v619_v2 }
 0x140   : > { %818 = shalt.err (!%p815_p7)
}
 0x141   : > { %s819_s21 = scalar_lea.hbm %s1138_s9, 128  ;;  %s823_s27 = scalar_lea.hbm %s1192_s3, 256 }
 0x142   : > { %p820_p9 = scmp.ne.s32.totalorder %s1138_s9, %s819_s21  ;;  %p824_p12 = scmp.lt.u32.totalorder %s1138_s9, %s1192_s3 }
 0x143   : > { %p825_p13 = scmp.lt.u32.totalorder %s823_s27, %s819_s21  ;;  %p827_p1 = scmp.lt.u32.totalorder %s819_s21, %s1138_s9 }
 0x144   : > { %p821_p10 = pnand %p820_p9, %p948_p4 }
 0x145   : > { %p826_p0 = por %p825_p13, %p824_p12 }
 0x146   : > { %p822_p11 = pneg %p821_p10 }
 0x147   : > { %p828_p2 = por %p827_p1, %p826_p0 }
 0x149   : > { %p829_p3 = pnand %p828_p2, %p822_p11 }
 0x14b   : > { %832 = shalt.err (!%p829_p3)
}
 0x14c   : > { %722 = dma.vmem_to_hbm [thread:$0]  (%p948_p4), %s1140_s6, 128, %s1138_s9, %s622_s15  }
 0x14d PF: > { %p728_p5 = scmp.ge.s32.totalorder %s883_s17, 2  ;;  %s647_s30 = sand.u32 1, %s863_s12  }
 0x14e   : > { %s648_s4 = scalar_lea.sflag [#allocation3], %s647_s30 }
 0x14f   : > { %p725_p6 = pnand %p728_p5, %p955_p8 }
 0x151   : > { %858 = dma.done.wait (!%p725_p6), %s648_s4, 128  }
 0x152   : > { %860 = vsyncadd (!%p725_p6), %s648_s4, 4294967168  ;;  %s16_s17 = sadd.s32 1, %s883_s17   ;;  %s1201_s12 = smov %s867_s13 }
 0x153   : > { %p13_p7 = scmp.ge.s32.totalorder %s16_s17, 4   ;;  %s1202_s13 = smov %s871_s14 }
 0x154   : > { %s1203_s14 = smov %s961_s25  ;;  %s1204_s15 = smov %s879_s16 }
 0x155   : > { %s1205_s16 = smov %s1207_s20  ;;  %15 = sbr.rel (!%p13_p7) target bundleno = 4 (0x4), region = 74 }
 0x15c   :  { %653 = vsyncpa [#allocation3], 1 }
 0x15d   :  { %655 = vsyncpa [#allocation3 + $0x1], 1 }

</bundles_post_ra>
